<compile_context>
chip_gen: v7x
topology: tpu7x:2x2x1
jax: 0.10.0
libtpu: 0.0.40
codegen_flags: <defaults>
</compile_context>

<pallas_src>
import functools

import jax
import jax.numpy as jnp
from jax.experimental import pallas as pl
from jax.experimental.pallas import tpu as pltpu

_MIB = 1024 * 1024


# --------------------------------------------------------------------------- #
# Chip-aware sizing helpers
# --------------------------------------------------------------------------- #
def _chip_vmem_budget_and_limit():
    """Per-generation (per-step VMEM budget, scoped vmem_limit_bytes)."""
    cap = None
    try:
        info = pltpu.get_tpu_info()
        for name in ("vmem_capacity_bytes", "vmem_size_bytes", "vmem_bytes"):
            v = getattr(info, name, None)
            if v:
                cap = int(v)
                break
    except Exception:
        cap = None
    if cap is None:
        # Fall back to a device_kind heuristic: v7x has 64 MiB VMEM per TC,
        # older parts (v5e/v6e/v5p/v4) have 128 MiB.
        try:
            kind = jax.devices()[0].device_kind.lower()
        except Exception:
            kind = ""
        cap = 64 * _MIB if ("7x" in kind or "v7" in kind) else 128 * _MIB
    if cap >= 100 * _MIB:
        # 128 MiB physical per TensorCore (v5e/v6e/v5p): spend it on bigger
        # class slabs -> fewer grid steps, larger DMAs.
        return 64 * _MIB, 96 * _MIB
    # v7x (64 MiB physical per TC) or unknown small part: stay conservative.
    return 24 * _MIB, 48 * _MIB


def _has_two_tensorcores():
    """True where one Pallas device spans 2 TensorCores (v4/v5p megacore, v7x)."""
    try:
        kind = jax.devices()[0].device_kind.lower()
    except Exception:
        return True  # conservative: keeping the clamp costs at most one step
    single_tc = ("v5 lite", "v5lite", "v5e", "v6 lite", "v6lite", "v6e", "v2", "v3")
    if any(t in kind for t in single_tc):
        return False
    return True


def _choose_class_block(n_cls, bytes_per_class, vmem_budget, two_tc):
    """How many classes to fuse per grid step."""
    cap = max(1, min(n_cls, vmem_budget // max(1, bytes_per_class)))
    if two_tc and n_cls >= 2:
        # Keep >= 2 grid steps so the "parallel" class axis can be sharded
        # across both TensorCores. Skipped on 1-TC chips where the grid is a
        # serial loop and this would only add per-step overhead.
        cap = min(cap, pl.cdiv(n_cls, 2))
    # Avoid a tiny remainder step: prefer the largest block <= cap that divides
    # n_cls evenly, unless that would more than double the step count.
    divisor = 1
    for c in range(cap, 0, -1):
        if n_cls % c == 0:
            divisor = c
            break
    return divisor if divisor * 2 > cap else cap


# --------------------------------------------------------------------------- #
# Kernels
# --------------------------------------------------------------------------- #
def _add_full_kernel(tok_ref, opt_ref, out_ref):
    # ctx_len == context_len: single lane/sublane-dense full-tile add.
    out_ref[...] = (tok_ref[...] + opt_ref[...]).astype(out_ref.dtype)


def _add_split_kernel(ctx_len, tok_ref, opt_ref, out_ref):
    # Learnable prefix. If ctx_len is not sublane-aligned this is a masked
    # boundary store *in VMEM* only; HBM traffic is unchanged and the optim
    # stream never reads padded zero rows from HBM.
    out_ref[:, :ctx_len, :] = (tok_ref[:, :ctx_len, :] + opt_ref[...]).astype(out_ref.dtype)
    # Frozen-zero padding tail -> pure copy; the zeros are never read from HBM.
    out_ref[:, ctx_len:, :] = tok_ref[:, ctx_len:, :].astype(out_ref.dtype)


def _add_split_pad_kernel(ctx_len, tok_ref, opt_ref, pad_ref, out_ref):
    # Full concat+add semantics when the caller's padding tensor may be nonzero.
    out_ref[:, :ctx_len, :] = (tok_ref[:, :ctx_len, :] + opt_ref[...]).astype(out_ref.dtype)
    out_ref[:, ctx_len:, :] = (tok_ref[:, ctx_len:, :] + pad_ref[...]).astype(out_ref.dtype)


# --------------------------------------------------------------------------- #
# Wrapper
# --------------------------------------------------------------------------- #
def simple_prompt_learning_forward(token_embedding, optim_param, padding_param=None,
                                   *, padding_is_zero=True, class_block=None,
                                   donate_token_embedding=False):
    """token_embedding + concat([optim_param, padding_param], axis=1).

    By default padding_param is assumed to be the module's frozen zeros and is
    never read from HBM; pass padding_is_zero=False to honour a nonzero tensor.
    """
    n_cls, context_len, ctx_dim = token_embedding.shape
    assert optim_param.shape[0] == n_cls and optim_param.shape[2] == ctx_dim
    ctx_len = int(optim_param.shape[1])
    pad_len = context_len - ctx_len
    assert pad_len >= 0 and ctx_len >= 1
    if padding_param is not None:
        assert padding_param.shape == (n_cls, pad_len, ctx_dim)

    read_padding = (not padding_is_zero) and (padding_param is not None) and pad_len > 0

    # Match PyTorch type promotion (e.g. bf16 embeddings + f32 params -> f32),
    # casting inside the kernel instead of pre-down/up-casting inputs in HBM.
    dtypes = [token_embedding.dtype, optim_param.dtype]
    if read_padding:
        dtypes.append(padding_param.dtype)
    out_dtype = jnp.result_type(*dtypes)

    def _isz(d):
        return jnp.dtype(d).itemsize

    if pad_len == 0:
        kernel = _add_full_kernel
        operands = (token_embedding, optim_param)
        opt_rows, pad_rows = context_len, 0
    elif read_padding:
        kernel = functools.partial(_add_split_pad_kernel, ctx_len)
        operands = (token_embedding, optim_param, padding_param)
        opt_rows, pad_rows = ctx_len, pad_len
    else:
        # padding_param is frozen zeros in the module -> never read from HBM.
        kernel = functools.partial(_add_split_kernel, ctx_len)
        operands = (token_embedding, optim_param)
        opt_rows, pad_rows = ctx_len, 0

    # Double-buffered per-step footprint: tok + opt (+ pad) inputs and the output.
    bytes_per_class = 2 * ctx_dim * (
        context_len * _isz(token_embedding.dtype)
        + opt_rows * _isz(optim_param.dtype)
        + (pad_rows * _isz(padding_param.dtype) if read_padding else 0)
        + context_len * _isz(out_dtype))

    vmem_budget, vmem_limit = _chip_vmem_budget_and_limit()
    c_blk = class_block or _choose_class_block(
        n_cls, bytes_per_class, vmem_budget, _has_two_tensorcores())
    grid = (pl.cdiv(n_cls, c_blk),)

    # The last two block dims always equal the full array extents, so the
    # (8, 128) divisibility rule is satisfied for any ctx_len / ctx_dim.
    # TODO(synk): if ctx_dim % 128 != 0, a wrapper-side flatten to
    # (n_cls, context_len*ctx_dim) would give wider lane-dense stores.
    in_specs = [
        pl.BlockSpec((c_blk, context_len, ctx_dim), lambda c: (c, 0, 0)),
        pl.BlockSpec((c_blk, opt_rows, ctx_dim), lambda c: (c, 0, 0)),
    ]
    if read_padding:
        in_specs.append(pl.BlockSpec((c_blk, pad_len, ctx_dim), lambda c: (c, 0, 0)))

    io_aliases = {}
    if donate_token_embedding and token_embedding.dtype == out_dtype:
        # Reuse token_embedding's HBM buffer for the output (bytes moved are
        # unchanged but the second output-sized HBM allocation disappears).
        io_aliases = {0: 0}

    return pl.pallas_call(
        kernel,
        out_shape=jax.ShapeDtypeStruct((n_cls, context_len, ctx_dim), out_dtype),
        grid=grid,
        in_specs=in_specs,
        out_specs=pl.BlockSpec((c_blk, context_len, ctx_dim), lambda c: (c, 0, 0)),
        compiler_params=pltpu.CompilerParams(
            dimension_semantics=("parallel",),
            vmem_limit_bytes=vmem_limit,
        ),
        input_output_aliases=io_aliases,
    )(*operands)


if __name__ == "__main__":
    # TODO(synk): clip.tokenize / model.token_embedding (CLIP tokenizer +
    # embedding lookup) are outside this module's tensor compute;
    # token_embedding is provided as a synthetic input.
    key = jax.random.PRNGKey(0)
    k1, k2, k3, k4, k5 = jax.random.split(key, 5)

    # Small shapes consistent with the module: len(classes)=16,
    # model.context_length=16, ctx_len=8, ctx_dim=128.
    n_cls, context_len, ctx_len, ctx_dim = 16, 16, 8, 128

    tok = jax.random.normal(k1, (n_cls, context_len, ctx_dim), jnp.float32)
    opt = 0.01 * jax.random.normal(k2, (n_cls, ctx_len, ctx_dim), jnp.float32)
    pad = jnp.zeros((n_cls, context_len - ctx_len, ctx_dim), jnp.float32)

    out = jax.block_until_ready(simple_prompt_learning_forward(tok, opt, pad))
    ref = tok + jnp.concatenate([opt, pad], axis=1)
    assert out.shape == ref.shape and out.dtype == ref.dtype
    assert jnp.allclose(out, ref, atol=1e-6, rtol=1e-6)

    # Sublane-unaligned learnable prefix (ctx_len=5): split stores, no HBM pad.
    ctx_len_u = 5
    tok_u = jax.random.normal(k3, (4, context_len, ctx_dim), jnp.float32)
    opt_u = 0.01 * jax.random.normal(k4, (4, ctx_len_u, ctx_dim), jnp.float32)
    out_u = jax.block_until_ready(simple_prompt_learning_forward(tok_u, opt_u))
    ref_u = tok_u.at[:, :ctx_len_u, :].add(opt_u)
    assert jnp.allclose(out_u, ref_u, atol=1e-6, rtol=1e-6)

    # Mixed dtypes follow promotion: bf16 embeddings + f32 params -> f32 output.
    out_m = jax.block_until_ready(
        simple_prompt_learning_forward(tok.astype(jnp.bfloat16), opt, pad))
    ref_m = tok.astype(jnp.bfloat16).astype(jnp.float32) + jnp.concatenate(
        [opt, pad], axis=1)
    assert out_m.dtype == jnp.float32
    assert jnp.allclose(out_m, ref_m, atol=1e-6, rtol=1e-6)

    # Non-zero padding tensor honoured with padding_is_zero=False.
    pad_nz = 0.01 * jax.random.normal(
        k5, (n_cls, context_len - ctx_len, ctx_dim), jnp.float32)
    out_p = jax.block_until_ready(
        simple_prompt_learning_forward(tok, opt, pad_nz, padding_is_zero=False))
    ref_p = tok + jnp.concatenate([opt, pad_nz], axis=1)
    assert jnp.allclose(out_p, ref_p, atol=1e-6, rtol=1e-6)

    print("KERNEL_OK")
</pallas_src>

<mosaic_0001>
module attributes {stable_mosaic.version = 11 : i64} {
  func.func @_add_split_kernel(%arg0: i32, %arg1: memref<8x16x128xf32, #tpu.memory_space<vmem>>, %arg2: memref<8x8x128xf32, #tpu.memory_space<vmem>>, %arg3: memref<8x16x128xf32, #tpu.memory_space<vmem>>) attributes {dimension_semantics = [#tpu.dimension_semantics<parallel>], iteration_bounds = array<i64: 2>, scalar_prefetch = 0 : i64, scratch_operands = 0 : i64, tpu.core_type = #tpu.core_type<tc>, window_params = [{transform_indices = @transform_0, window_bounds = array<i64: 8, 16, 128>}, {transform_indices = @transform_1, window_bounds = array<i64: 8, 8, 128>}, {transform_indices = @transform_2, window_bounds = array<i64: 8, 16, 128>}]} {
    %c0 = arith.constant 0 : index
    %c0_0 = arith.constant 0 : index
    %c0_1 = arith.constant 0 : index
    %0 = vector.load %arg1[%c0, %c0_0, %c0_1] : memref<8x16x128xf32, #tpu.memory_space<vmem>>, vector<8x8x128xf32>
    %c0_2 = arith.constant 0 : index
    %c0_3 = arith.constant 0 : index
    %c0_4 = arith.constant 0 : index
    %1 = vector.load %arg2[%c0_2, %c0_3, %c0_4] : memref<8x8x128xf32, #tpu.memory_space<vmem>>, vector<8x8x128xf32>
    %2 = arith.addf %0, %1 : vector<8x8x128xf32>
    %c0_5 = arith.constant 0 : index
    %c0_6 = arith.constant 0 : index
    %c0_7 = arith.constant 0 : index
    %3 = vector.load %arg3[%c0_5, %c0_6, %c0_7] : memref<8x16x128xf32, #tpu.memory_space<vmem>>, vector<8x8x128xf32>
    tpu.vector_store %arg3[%c0_5, %c0_6, %c0_7], %2 {strides = array<i32>} : memref<8x16x128xf32, #tpu.memory_space<vmem>>, vector<8x8x128xf32>,
    %c0_8 = arith.constant 0 : index
    %c8 = arith.constant 8 : index
    %c0_9 = arith.constant 0 : index
    %4 = vector.load %arg1[%c0_8, %c8, %c0_9] : memref<8x16x128xf32, #tpu.memory_space<vmem>>, vector<8x8x128xf32>
    %c0_10 = arith.constant 0 : index
    %c8_11 = arith.constant 8 : index
    %c0_12 = arith.constant 0 : index
    %5 = vector.load %arg3[%c0_10, %c8_11, %c0_12] : memref<8x16x128xf32, #tpu.memory_space<vmem>>, vector<8x8x128xf32>
    tpu.vector_store %arg3[%c0_10, %c8_11, %c0_12], %4 {strides = array<i32>} : memref<8x16x128xf32, #tpu.memory_space<vmem>>, vector<8x8x128xf32>,
    return
  }
  func.func @transform_0(%arg0: i32) -> (i32, i32, i32) {
    %c0_i32 = arith.constant 0 : i32
    %c0_i32_0 = arith.constant 0 : i32
    %c0_i32_1 = arith.constant 0 : i32
    return %arg0, %c0_i32, %c0_i32_0 : i32, i32, i32
  }
  func.func @transform_1(%arg0: i32) -> (i32, i32, i32) {
    %c0_i32 = arith.constant 0 : i32
    %c0_i32_0 = arith.constant 0 : i32
    %c0_i32_1 = arith.constant 0 : i32
    return %arg0, %c0_i32, %c0_i32_0 : i32, i32, i32
  }
  func.func @transform_2(%arg0: i32) -> (i32, i32, i32) {
    %c0_i32 = arith.constant 0 : i32
    %c0_i32_0 = arith.constant 0 : i32
    %c0_i32_1 = arith.constant 0 : i32
    return %arg0, %c0_i32, %c0_i32_0 : i32, i32, i32
  }
}

</mosaic_0001>

<bundles_post_ra>
// kernel: tpu_custom_call.1
= control target key start
LH: loop header
LB: loop body
LE: loop exit
PB: predicated region body
PF: predicated region fallthrough
CT: control target
= control target key end

     0   :  { %7 = vsyncpa [#allocation3], 0  ;;  %s864_s0 = inlined_call_operand.hbm [shape: f32[16,16,128], index: 0, kind: input, shape index: {}]   ;;  %s865_s1 = inlined_call_operand.hbm [shape: f32[16,8,128], index: 1, kind: input, shape index: {}]   ;;  %s866_s2 = inlined_call_operand.hbm [shape: f32[16,16,128], index: 2, kind: output, shape index: {}]  }
   0x1   :  { %9 = vsyncpa [#allocation3 + $0x1], 0 }
   0x2   :  { %10 = vsyncpa [#allocation6], 0 }
   0x3   :  { %12 = vsyncpa [#allocation6 + $0x1], 0 }
   0x4   :  { %13 = vsyncpa [#allocation4], 0 }
   0x5   :  { %15 = vsyncpa [#allocation4 + $0x1], 0  ;;  %s599_s9 = smov 0   ;;  %s601_s10 = smov 0  }
   0x6   :  { %s603_s11 = smov 0   ;;  %s605_s12 = smov 0  }
   0x7 LB: > { %s620_s13 = sadd.s32 4294967295, %s575_s12   ;;  %s365_s14 = sadd.s32 4294967294, %s575_s12   ;;  %s575_s12 = sphi %s605_s12, %s882_s12   ;;  %s571_s11 = sphi %s603_s11, %s881_s11   ;;  %s567_s10 = sphi %s601_s10, %s880_s10   ;;  %s563_s9 = sphi %s599_s9, %s879_s9  }
   0x8   : > { %s624_s15 = sadd.s32 1, %s575_s12   ;;  %s28_s16 = sadd.s32 1, %s571_s11 }
   0x9   : > { %s25_s17 = ssub.s32 %s575_s12, %s624_s15  ;;  %p35_p0 = scmp.ne.s32.totalorder %s571_s11, %s567_s10 }
   0xa   : > { %p26_p1 = scmp.eq.s32.totalorder %s25_s17, 0  ;;  %p36_p2 = scmp.eq.s32.totalorder %s575_s12, 0 }
   0xb   : > { %p41_p3 = scmp.ne.s32.totalorder %s567_s10, %s563_s9  ;;  %p42_p4 = scmp.eq.s32.totalorder %s620_s13, 0 }
   0xc   : > { %s636_s18 = scalar_select %p26_p1, %s571_s11, %s28_s16  }
   0xd   : > { %p638_p5 = por %p36_p2, %p35_p0  ;;  %p642_p6 = por %p42_p4, %p41_p3 }
   0xe   : > { %p91_p7 = scmp.eq.s32.totalorder %s620_s13, 1  ;;  %p97_p8 = scmp.eq.s32.totalorder %s365_s14, 1 }
   0xf   : > { %s870_s20 = scalar_select %p642_p6, 1, 0 }
  0x10   : > { %p407_p10 = scmp.lt.s32.totalorder %s575_s12, 2  ;;  %p649_p11 = por %p91_p7, %p35_p0 }
  0x11   : > { %p653_p12 = por %p97_p8, %p41_p3  ;;  %s658_s23 = sand.u32 1, %s571_s11  }
  0x12   : > { %s871_s21 = scalar_select %p649_p11, 1, 0 }
  0x13   : > { %s872_s22 = scalar_select %p653_p12, 1, 0 }
  0x14   : > { %s386_s24 = sshll.u32 %s575_s12, 11  ;;  %s368_s25 = sshll.u32 %s658_s23, 7 }
  0x15   : > { %s665_s28 = scalar_lea.hbm %s864_s0, %s386_s24  ;;  %s121_s29 = scalar_lea.vmem [#allocation2], %s368_s25 }
  0x16   : > { %s129_s30 = sshll.u32 %s121_s29, 4  ;;  %p669_p13 = pnand %p407_p10, %p638_p5  ;;  %s673_s30 = int_to_ptr.vmem [resolvable:$true] %s129_s30 }
  0x17   : > { %s118_s4 = scalar_lea.sflag [#allocation3], %s658_s23  ;;  %s445_s5 = scalar_lea.hbm %s665_s28, 2048 }
  0x18   : > { %p446_p0 = scmp.ne.s32.totalorder %s665_s28, %s445_s5  ;;  %p447_p1 = pneg %p669_p13 }
  0x19   : > { %s450_s8 = scalar_lea.hbm %s864_s0, 4096  ;;  %p451_p4 = scmp.lt.u32.totalorder %s665_s28, %s864_s0 }
  0x1a   : > { %p448_p2 = pnand %p447_p1, %p446_p0  ;;  %p452_p5 = scmp.lt.u32.totalorder %s450_s8, %s445_s5 }
  0x1b   : > { %p454_p8 = scmp.lt.u32.totalorder %s445_s5, %s665_s28 }
  0x1c   : > { %p449_p3 = pneg %p448_p2  ;;  %p453_p7 = por %p452_p5, %p451_p4 }
  0x1e   : > { %p455_p10 = por %p454_p8, %p453_p7 }
  0x20   : > { %p456_p9 = pnand %p455_p10, %p449_p3 }
  0x22   : > { %459 = shalt.err (!%p456_p9)
}
  0x23   : > { %s460_s17 = scalar_lea.vmem %s673_s30, 2048  ;;  %s577_s19 = smov [#allocation2]  }
  0x24   : > { %p461_p0 = scmp.ne.s32.totalorder %s673_s30, %s460_s17  ;;  %s465_s24 = sshll.u32 %s577_s19, 4  ;;  %s466_s24 = int_to_ptr.vmem [resolvable:$false] %s465_s24 }
  0x25   : > { %s467_s25 = scalar_lea.vmem %s466_s24, 4096  ;;  %p468_p11 = scmp.lt.s32.totalorder %s673_s30, %s466_s24 }
  0x26   : > { %p463_p2 = pnand %p461_p0, %p447_p1  ;;  %p469_p4 = scmp.lt.s32.totalorder %s467_s25, %s460_s17 }
  0x28   : > { %p464_p12 = pneg %p463_p2  ;;  %p470_p5 = por %p469_p4, %p468_p11 }
  0x2a   : > { %p471_p7 = pnand %p470_p5, %p464_p12 }
  0x2c   : > { %474 = shalt.err (!%p471_p7)
}
  0x2d   : > { %s578_s26 = smov 128   ;;  %s579_s27 = smov 8  }
  0x2e   : > { %399 = dma.hbm_to_vmem [thread:$0]  (!%p669_p13), %s665_s28, 2048, %s673_s30, %s118_s4, %s578_s26, %s578_s26, %s579_s27  }
  0x2f   : > { %p375_p9 = scmp.ge.s32.totalorder %s575_s12, 1  ;;  %p158_p11 = scmp.lt.s32.totalorder %s575_s12, 3 }
  0x30   : > { %s372_s29 = sshll.u32 %s658_s23, 6  ;;  %s387_s6 = sshll.u32 %s575_s12, 10 }
  0x31   : > { %p709_p12 = pnand %p375_p9, %p158_p11  ;;  %s143_s7 = scalar_lea.vmem [#allocation5], %s372_s29 }
  0x32   : > { %s150_s8 = sshll.u32 %s143_s7, 4  ;;  %s717_s17 = scalar_lea.hbm %s865_s1, %s387_s6  ;;  %s719_s8 = int_to_ptr.vmem [resolvable:$true] %s150_s8 }
  0x33   : > { %s140_s28 = scalar_lea.sflag [#allocation6], %s658_s23  ;;  %s475_s30 = scalar_lea.hbm %s717_s17, 1024 }
  0x34   : > { %p476_p3 = scmp.ne.s32.totalorder %s717_s17, %s475_s30  ;;  %s480_s24 = scalar_lea.hbm %s865_s1, 2048 }
  0x35   : > { %p481_p0 = scmp.lt.u32.totalorder %s717_s17, %s865_s1  ;;  %p482_p2 = scmp.lt.u32.totalorder %s480_s24, %s475_s30 }
  0x36   : > { %p478_p8 = pnand %p476_p3, %p447_p1  ;;  %p484_p5 = scmp.lt.u32.totalorder %s475_s30, %s717_s17 }
  0x37   : > { %p483_p4 = por %p482_p2, %p481_p0 }
  0x38   : > { %p479_p10 = pneg %p478_p8 }
  0x39   : > { %p485_p7 = por %p484_p5, %p483_p4 }
  0x3b   : > { %p486_p9 = pnand %p485_p7, %p479_p10 }
  0x3d   : > { %489 = shalt.err (!%p486_p9)
}
  0x3e   : > { %s490_s6 = scalar_lea.vmem %s719_s8, 1024  ;;  %s580_s7 = smov [#allocation5]  }
  0x3f   : > { %p491_p11 = scmp.ne.s32.totalorder %s719_s8, %s490_s6  ;;  %s495_s14 = sshll.u32 %s580_s7, 4  ;;  %s496_s14 = int_to_ptr.vmem [resolvable:$false] %s495_s14 }
  0x40   : > { %s497_s16 = scalar_lea.vmem %s496_s14, 2048  ;;  %p498_p6 = scmp.lt.s32.totalorder %s719_s8, %s496_s14 }
  0x41   : > { %p493_p3 = pnand %p491_p11, %p447_p1  ;;  %p499_p0 = scmp.lt.s32.totalorder %s497_s16, %s490_s6 }
  0x43   : > { %p494_p8 = pneg %p493_p3  ;;  %p500_p2 = por %p499_p0, %p498_p6 }
  0x45   : > { %p501_p4 = pnand %p500_p2, %p494_p8 }
  0x47   : > { %504 = shalt.err (!%p501_p4)
}
  0x48   : > { %402 = dma.hbm_to_vmem [thread:$0]  (!%p669_p13), %s717_s17, 1024, %s719_s8, %s140_s28, %s578_s26, %s578_s26, %s579_s27  }
  0x49   : > { %162 = sbr.rel (%p709_p12) target bundleno = 111 (0x6f), region = 28  ;;  %s753_s30 = sand.u32 (!%p709_p12), 1, %s567_s10  }
  0x4a   : > { %s376_s4 = sshll.u32 (!%p709_p12), %s753_s30, 7  ;;  %s165_s19 = scalar_lea.sflag (!%p709_p12), [#allocation3], %s753_s30 }
  0x4b   : > { %s757_s3 = scalar_lea.vmem (!%p709_p12), [#allocation2], %s376_s4  ;;  %p875_p6 = scmp.ne.s32.totalorder (!%p709_p12), %s870_s20, 0 }
  0x50   : > { %550 = dma.done.wait (%p875_p6), %s165_s19, 2048  }
  0x51   : > { %552 = vsyncadd (%p875_p6), %s165_s19, 4294965248  ;;  %s377_s23 = sshll.u32 %s753_s30, 6  ;;  %s174_s26 = scalar_lea.sflag [#allocation6], %s753_s30 }
  0x52   : > { %s765_s27 = scalar_lea.vmem [#allocation5], %s377_s23 }
  0x53   : > { %554 = dma.done.wait (%p875_p6), %s174_s26, 1024  }
  0x54   : > { %556 = vsyncadd (%p875_p6), %s174_s26, 4294966272  ;;  %v206_v0 = vld [vmem:[%s757_s3] sm:$0xff]  ;;  %v207_v2 = vld [vmem:[%s757_s3 + $0x10] sm:$0xff]  ;;  %s389_s20 = sshll.u32 %s620_s13, 11  ;;  %s781_s5 = scalar_lea.vmem [#allocation7], %s376_s4 }
  0x55   : > { %v214_v1 = vld [vmem:[%s765_s27] sm:$0xff]  ;;  %v215_v4 = vld [vmem:[%s765_s27 + $0x8] sm:$0xff]  ;;  %v216_v6 = vld [vmem:[%s765_s27 + $0x10] sm:$0xff]  ;;  %s269_s8 = sshll.u32 %s781_s5, 4  ;;  %s800_s28 = scalar_lea.hbm %s866_s2, %s389_s20  ;;  %s802_s8 = int_to_ptr.vmem [resolvable:$true] %s269_s8 }
  0x56   : > { %v222_v3 = vadd.f32 %v214_v1, %v206_v0  ;;  %v208_v5 = vld [vmem:[%s757_s3 + $0x20] sm:$0xff]  ;;  %v223_v7 = vadd.f32 %v215_v4, %v207_v2  ;;  %v209_v9 = vld [vmem:[%s757_s3 + $0x30] sm:$0xff]  ;;  %v217_v10 = vld [vmem:[%s765_s27 + $0x18] sm:$0xff]  ;;  %s255_s24 = scalar_lea.sflag [#allocation4], %s753_s30  ;;  %s505_s25 = scalar_lea.vmem %s802_s8, 2048 }
  0x57   : > { %v224_v8 = vadd.f32 %v216_v6, %v208_v5  ;;  %v210_v11 = vld [vmem:[%s757_s3 + $0x40] sm:$0xff]  ;;  %v225_v12 = vadd.f32 %v217_v10, %v209_v9  ;;  %v211_v14 = vld [vmem:[%s757_s3 + $0x50] sm:$0xff]  ;;  %v219_v15 = vld [vmem:[%s765_s27 + $0x28] sm:$0xff]  ;;  %p506_p13 = scmp.ne.s32.totalorder %s802_s8, %s505_s25  ;;  %p876_p1 = scmp.ne.s32.totalorder %s871_s21, 0 }
  0x58   : > { %230 = vst [vmem:[%s781_s5] sm:$0xff] %v222_v3  ;;  %v218_v13 = vld [vmem:[%s765_s27 + $0x20] sm:$0xff]  ;;  %231 = vst [vmem:[%s781_s5 + $0x10] sm:$0xff] %v223_v7  ;;  %v227_v17 = vadd.f32 %v219_v15, %v211_v14  ;;  %v220_v19 = vld [vmem:[%s765_s27 + $0x30] sm:$0xff]  ;;  %s581_s29 = smov [#allocation7]  }
  0x59   : > { %232 = vst [vmem:[%s781_s5 + $0x20] sm:$0xff] %v224_v8  ;;  %v226_v16 = vadd.f32 %v218_v13, %v210_v11  ;;  %v212_v18 = vld [vmem:[%s757_s3 + $0x60] sm:$0xff]  ;;  %v213_v20 = vld [vmem:[%s757_s3 + $0x70] sm:$0xff]  ;;  %233 = vst [vmem:[%s781_s5 + $0x30] sm:$0xff] %v225_v12  ;;  %p507_p12 = pnand %p506_p13, %p876_p1  ;;  %s509_s6 = sshll.u32 %s581_s29, 4  ;;  %s510_s6 = int_to_ptr.vmem [resolvable:$false] %s509_s6 }
  0x5a   : > { %v228_v21 = vadd.f32 %v220_v19, %v212_v18  ;;  %v221_v22 = vld [vmem:[%s765_s27 + $0x38] sm:$0xff]  ;;  %v238_v23 = vld [vmem:[%s757_s3 + $0x8] sm:$0xff]  ;;  %235 = vst [vmem:[%s781_s5 + $0x50] sm:$0xff] %v227_v17  ;;  %s511_s7 = scalar_lea.vmem %s510_s6, 4096  ;;  %p512_p5 = scmp.lt.s32.totalorder %s802_s8, %s510_s6 }
  0x5b   : > { %v239_v24 = vld [vmem:[%s757_s3 + $0x18] sm:$0xff]  ;;  %234 = vst [vmem:[%s781_s5 + $0x40] sm:$0xff] %v226_v16  ;;  %v229_v25 = vadd.f32 %v221_v22, %v213_v20  ;;  %246 = vst [vmem:[%s781_s5 + $0x8] sm:$0xff] %v238_v23  ;;  %v240_v26 = vld [vmem:[%s757_s3 + $0x28] sm:$0xff]  ;;  %p508_p10 = pneg %p507_p12  ;;  %p513_p7 = scmp.lt.s32.totalorder %s511_s7, %s505_s25 }
  0x5c   : > { %247 = vst [vmem:[%s781_s5 + $0x18] sm:$0xff] %v239_v24  ;;  %v241_v27 = vld [vmem:[%s757_s3 + $0x38] sm:$0xff]  ;;  %v242_v28 = vld [vmem:[%s757_s3 + $0x48] sm:$0xff]  ;;  %236 = vst [vmem:[%s781_s5 + $0x60] sm:$0xff] %v228_v21 }
  0x5d   : > { %248 = vst [vmem:[%s781_s5 + $0x28] sm:$0xff] %v240_v26  ;;  %249 = vst [vmem:[%s781_s5 + $0x38] sm:$0xff] %v241_v27  ;;  %v243_v29 = vld [vmem:[%s757_s3 + $0x58] sm:$0xff]  ;;  %v244_v30 = vld [vmem:[%s757_s3 + $0x68] sm:$0xff]  ;;  %p514_p9 = por %p513_p7, %p512_p5 }
  0x5e   : > { %250 = vst [vmem:[%s781_s5 + $0x48] sm:$0xff] %v242_v28  ;;  %v245_v31 = vld [vmem:[%s757_s3 + $0x78] sm:$0xff]  ;;  %237 = vst [vmem:[%s781_s5 + $0x70] sm:$0xff] %v229_v25 }
  0x5f   : > { %251 = vst [vmem:[%s781_s5 + $0x58] sm:$0xff] %v243_v29  ;;  %252 = vst [vmem:[%s781_s5 + $0x68] sm:$0xff] %v244_v30  ;;  %p515_p11 = pnand %p514_p9, %p508_p10 }
  0x60   : > { %253 = vst [vmem:[%s781_s5 + $0x78] sm:$0xff] %v245_v31 }
  0x61   : > { %518 = shalt.err (!%p515_p11)
}
  0x62   : > { %s519_s14 = scalar_lea.hbm %s800_s28, 2048  ;;  %s523_s19 = scalar_lea.hbm %s866_s2, 4096 }
  0x63   : > { %p520_p3 = scmp.ne.s32.totalorder %s800_s28, %s519_s14  ;;  %p524_p2 = scmp.lt.u32.totalorder %s800_s28, %s866_s2 }
  0x64   : > { %p525_p4 = scmp.lt.u32.totalorder %s523_s19, %s519_s14  ;;  %p527_p13 = scmp.lt.u32.totalorder %s519_s14, %s800_s28 }
  0x65   : > { %p521_p8 = pnand %p520_p3, %p876_p1 }
  0x66   : > { %p526_p6 = por %p525_p4, %p524_p2 }
  0x67   : > { %p522_p0 = pneg %p521_p8 }
  0x68   : > { %p528_p12 = por %p527_p13, %p526_p6 }
  0x6a   : > { %p529_p10 = pnand %p528_p12, %p522_p0 }
  0x6c   : > { %532 = shalt.err (!%p529_p10)
}
  0x6d   : > { %s582_s26 = smov 128   ;;  %s583_s27 = smov 8  }
  0x6e   : > { %394 = dma.vmem_to_hbm [thread:$0]  (%p876_p1), %s802_s8, 2048, %s800_s28, %s255_s24, %s582_s26, %s582_s26, %s583_s27  }
  0x6f PF: > { %s284_s20 = sand.u32 1, %s563_s9   ;;  %p877_p5 = scmp.ne.s32.totalorder %s872_s22, 0 }
  0x70   : > { %p878_p7 = scmp.ge.s32.totalorder %s575_s12, 2  ;;  %s285_s5 = scalar_lea.sflag [#allocation4], %s284_s20 }
  0x72   : > { %p404_p9 = pnand %p878_p7, %p877_p5 }
  0x74   : > { %558 = dma.done.wait (!%p404_p9), %s285_s5, 2048  }
  0x75   : > { %560 = vsyncadd (!%p404_p9), %s285_s5, 4294965248  ;;  %p18_p11 = scmp.ge.s32.totalorder %s624_s15, 4   ;;  %s879_s9 = smov %s567_s10 }
  0x76   : > { %s880_s10 = smov %s571_s11  ;;  %s881_s11 = smov %s636_s18 }
  0x77   : > { %s882_s12 = smov %s624_s15  ;;  %20 = sbr.rel (!%p18_p11) target bundleno = 7 (0x7), region = 86 }
  0x7e   :  { %290 = vsyncpa [#allocation3], 1 }
  0x7f   :  { %292 = vsyncpa [#allocation3 + $0x1], 1 }
  0x80   :  { %293 = vsyncpa [#allocation6], 1 }
  0x81   :  { %295 = vsyncpa [#allocation6 + $0x1], 1 }
  0x82   :  { %296 = vsyncpa [#allocation4], 1 }
  0x83   :  { %298 = vsyncpa [#allocation4 + $0x1], 1 }

</bundles_post_ra>
